<compile_context>
chip_gen: v7x
topology: tpu7x:2x2x1
jax: 0.10.0
libtpu: 0.0.40
codegen_flags: <defaults>
</compile_context>

<pallas_src>
import jax
import jax.numpy as jnp
from jax.experimental import pallas as pl
from jax.experimental.pallas import tpu as pltpu

K_IN = 28 * 28      # 784
K_PAD = 896         # 7 * 128  (contraction dim padded to full lane tiles)
H = 64
H_PAD = 128         # hidden dims padded to one full lane tile
OUT = 10
OUT_PAD = 128       # lane-dense output; sliced back to 10 in the wrapper


def _round_up(x, m):
    return ((x + m - 1) // m) * m


def mlp_kernel(x_ref, w1_ref, b1_ref, w2_ref, b2_ref, w3_ref, b3_ref, o_ref):
    # x_ref: (TB, K_PAD) bf16; weights bf16; biases f32; o_ref: (TB, OUT_PAD) f32
    x = x_ref[...]
    h1 = jnp.dot(x, w1_ref[...], preferred_element_type=jnp.float32) + b1_ref[...]
    h1 = jnp.maximum(h1, 0.0)
    h2 = jnp.dot(h1.astype(jnp.bfloat16), w2_ref[...],
                 preferred_element_type=jnp.float32) + b2_ref[...]
    h2 = jnp.maximum(h2, 0.0)
    o_ref[...] = jnp.dot(h2.astype(jnp.bfloat16), w3_ref[...],
                         preferred_element_type=jnp.float32) + b3_ref[...]


def prepare_params(params):
    """One-time prep: zero-pad to lane-friendly shapes and cast weights to bf16."""
    w1, b1, w2, b2, w3, b3 = params
    w1p = jnp.zeros((K_PAD, H_PAD), jnp.float32).at[:K_IN, :H].set(w1)
    b1p = jnp.zeros((1, H_PAD), jnp.float32).at[:, :H].set(b1)
    w2p = jnp.zeros((H_PAD, H_PAD), jnp.float32).at[:H, :H].set(w2)
    b2p = jnp.zeros((1, H_PAD), jnp.float32).at[:, :H].set(b2)
    w3p = jnp.zeros((H_PAD, OUT_PAD), jnp.float32).at[:H, :OUT].set(w3)
    b3p = jnp.zeros((1, OUT_PAD), jnp.float32).at[:, :OUT].set(b3)
    return (w1p.astype(jnp.bfloat16), b1p,
            w2p.astype(jnp.bfloat16), b2p,
            w3p.astype(jnp.bfloat16), b3p)


def pad_and_cast_input(x_nchw):
    """nn.Flatten on NCHW + zero-pad 784->896 + bf16 cast."""
    B = x_nchw.shape[0]
    x_flat = x_nchw.reshape(B, -1).astype(jnp.float32)
    x_pad = jnp.zeros((B, K_PAD), jnp.float32).at[:, :K_IN].set(x_flat)
    return x_pad.astype(jnp.bfloat16)


def mlp_forward(x_nchw, prepped_params, *, tile_b=512):
    w1, b1, w2, b2, w3, b3 = prepped_params
    B = x_nchw.shape[0]
    x_pad = pad_and_cast_input(x_nchw)

    # Batch tile: multiple of 128 (MXU/sublane friendly), capped at tile_b.
    TB = min(tile_b, _round_up(B, 128))
    B_pad = _round_up(B, TB)
    if B_pad != B:
        x_pad = jnp.pad(x_pad, ((0, B_pad - B), (0, 0)))

    grid = (B_pad // TB,)
    out = pl.pallas_call(
        mlp_kernel,
        out_shape=jax.ShapeDtypeStruct((B_pad, OUT_PAD), jnp.float32),
        grid=grid,
        in_specs=[
            pl.BlockSpec((TB, K_PAD), lambda i: (i, 0)),        # x tile, pipelined
            pl.BlockSpec((K_PAD, H_PAD), lambda i: (0, 0)),     # w1, VMEM-resident
            pl.BlockSpec((1, H_PAD), lambda i: (0, 0)),         # b1
            pl.BlockSpec((H_PAD, H_PAD), lambda i: (0, 0)),     # w2
            pl.BlockSpec((1, H_PAD), lambda i: (0, 0)),         # b2
            pl.BlockSpec((H_PAD, OUT_PAD), lambda i: (0, 0)),   # w3
            pl.BlockSpec((1, OUT_PAD), lambda i: (0, 0)),       # b3
        ],
        out_specs=pl.BlockSpec((TB, OUT_PAD), lambda i: (i, 0)),
        compiler_params=pltpu.CompilerParams(
            dimension_semantics=("parallel",),          # megacore shard on v7x
            vmem_limit_bytes=32 * 1024 * 1024,          # plenty; above v5e default
        ),
    )(x_pad, w1, b1, w2, b2, w3, b3)
    return out[:B, :OUT]


def init_params(key):
    """Deterministic init mimicking PyTorch nn.Linear default (U(-1/sqrt(fan_in), +))."""
    def linear(k, fan_in, fan_out):
        kw, kb = jax.random.split(k)
        bound = 1.0 / jnp.sqrt(fan_in)
        # stored as (in_features, out_features) so kernel computes x @ W
        w = jax.random.uniform(kw, (fan_in, fan_out), jnp.float32, -bound, bound)
        b = jax.random.uniform(kb, (1, fan_out), jnp.float32, -bound, bound)
        return w, b

    k1, k2, k3 = jax.random.split(key, 3)
    w1, b1 = linear(k1, K_IN, H)
    w2, b2 = linear(k2, H, H)
    w3, b3 = linear(k3, H, OUT)
    return (w1, b1, w2, b2, w3, b3)


if __name__ == "__main__":
    key = jax.random.PRNGKey(0)
    k_params, k_x = jax.random.split(key)

    params = init_params(k_params)
    prepped = prepare_params(params)

    # small MNIST-like batch: (B=2, C=1, H=28, W=28), NCHW
    x = jax.random.normal(k_x, (2, 1, 28, 28), dtype=jnp.float32)

    logits = mlp_forward(x, prepped)
    logits = jax.block_until_ready(logits)
    assert logits.shape == (2, 10)

    # reference check in plain JAX using the *same* bf16/padded operands
    w1p, b1p, w2p, b2p, w3p, b3p = prepped
    xp = pad_and_cast_input(x)
    ref = jnp.maximum(jnp.dot(xp, w1p, preferred_element_type=jnp.float32) + b1p, 0.0)
    ref = jnp.maximum(jnp.dot(ref.astype(jnp.bfloat16), w2p,
                              preferred_element_type=jnp.float32) + b2p, 0.0)
    ref = (jnp.dot(ref.astype(jnp.bfloat16), w3p,
                   preferred_element_type=jnp.float32) + b3p)[:, :OUT]
    assert jnp.allclose(logits, ref, atol=1e-2, rtol=1e-2), (
        f"max abs diff {jnp.max(jnp.abs(logits - ref))}")

    print("KERNEL_OK")
</pallas_src>

<mosaic_0001>
module attributes {stable_mosaic.version = 11 : i64} {
  func.func @mlp_kernel(%arg0: i32, %arg1: memref<128x896xbf16, #tpu.memory_space<vmem>>, %arg2: memref<896x128xbf16, #tpu.memory_space<vmem>>, %arg3: memref<1x128xf32, #tpu.memory_space<vmem>>, %arg4: memref<128x128xbf16, #tpu.memory_space<vmem>>, %arg5: memref<1x128xf32, #tpu.memory_space<vmem>>, %arg6: memref<128x128xbf16, #tpu.memory_space<vmem>>, %arg7: memref<1x128xf32, #tpu.memory_space<vmem>>, %arg8: memref<128x128xf32, #tpu.memory_space<vmem>>) attributes {dimension_semantics = [#tpu.dimension_semantics<parallel>], iteration_bounds = array<i64: 1>, scalar_prefetch = 0 : i64, scratch_operands = 0 : i64, tpu.core_type = #tpu.core_type<tc>, window_params = [{transform_indices = @transform_0, window_bounds = array<i64: 128, 896>}, {pipeline_mode = #tpu.pipeline_mode<synchronous>, transform_indices = @transform_1, window_bounds = array<i64: 896, 128>}, {pipeline_mode = #tpu.pipeline_mode<synchronous>, transform_indices = @transform_2, window_bounds = array<i64: 1, 128>}, {pipeline_mode = #tpu.pipeline_mode<synchronous>, transform_indices = @transform_3, window_bounds = array<i64: 128, 128>}, {pipeline_mode = #tpu.pipeline_mode<synchronous>, transform_indices = @transform_4, window_bounds = array<i64: 1, 128>}, {pipeline_mode = #tpu.pipeline_mode<synchronous>, transform_indices = @transform_5, window_bounds = array<i64: 128, 128>}, {pipeline_mode = #tpu.pipeline_mode<synchronous>, transform_indices = @transform_6, window_bounds = array<i64: 1, 128>}, {transform_indices = @transform_7, window_bounds = array<i64: 128, 128>}]} {
    %c0 = arith.constant 0 : index
    %c0_0 = arith.constant 0 : index
    %0 = vector.load %arg1[%c0, %c0_0] : memref<128x896xbf16, #tpu.memory_space<vmem>>, vector<128x896xbf16>
    %c0_1 = arith.constant 0 : index
    %c0_2 = arith.constant 0 : index
    %1 = vector.load %arg2[%c0_1, %c0_2] : memref<896x128xbf16, #tpu.memory_space<vmem>>, vector<896x128xbf16>
    %cst = arith.constant dense<0.000000e+00> : vector<128x128xf32>
    %2 = tpu.matmul %0, %1, %cst {dimension_numbers = #tpu.dot_dimension_numbers<[1], [0], [0], [1], [0, 0, 1, 1], [], []>} : vector<128x896xbf16>, vector<896x128xbf16>, vector<128x128xf32> -> vector<128x128xf32>
    %c0_3 = arith.constant 0 : index
    %c0_4 = arith.constant 0 : index
    %3 = vector.load %arg3[%c0_3, %c0_4] : memref<1x128xf32, #tpu.memory_space<vmem>>, vector<1x128xf32>
    %4 = vector.broadcast %3 : vector<1x128xf32> to vector<128x128xf32>
    %5 = arith.addf %2, %4 : vector<128x128xf32>
    %cst_5 = arith.constant 0.000000e+00 : f32
    %6 = vector.broadcast %cst_5 : f32 to vector<128x128xf32>
    %7 = arith.maximumf %5, %6 : vector<128x128xf32>
    %8 = arith.truncf %7 : vector<128x128xf32> to vector<128x128xbf16>
    %c0_6 = arith.constant 0 : index
    %c0_7 = arith.constant 0 : index
    %9 = vector.load %arg4[%c0_6, %c0_7] : memref<128x128xbf16, #tpu.memory_space<vmem>>, vector<128x128xbf16>
    %cst_8 = arith.constant dense<0.000000e+00> : vector<128x128xf32>
    %10 = tpu.matmul %8, %9, %cst_8 {dimension_numbers = #tpu.dot_dimension_numbers<[1], [0], [0], [1], [0, 0, 1, 1], [], []>} : vector<128x128xbf16>, vector<128x128xbf16>, vector<128x128xf32> -> vector<128x128xf32>
    %c0_9 = arith.constant 0 : index
    %c0_10 = arith.constant 0 : index
    %11 = vector.load %arg5[%c0_9, %c0_10] : memref<1x128xf32, #tpu.memory_space<vmem>>, vector<1x128xf32>
    %12 = vector.broadcast %11 : vector<1x128xf32> to vector<128x128xf32>
    %13 = arith.addf %10, %12 : vector<128x128xf32>
    %cst_11 = arith.constant 0.000000e+00 : f32
    %14 = vector.broadcast %cst_11 : f32 to vector<128x128xf32>
    %15 = arith.maximumf %13, %14 : vector<128x128xf32>
    %16 = arith.truncf %15 : vector<128x128xf32> to vector<128x128xbf16>
    %c0_12 = arith.constant 0 : index
    %c0_13 = arith.constant 0 : index
    %17 = vector.load %arg6[%c0_12, %c0_13] : memref<128x128xbf16, #tpu.memory_space<vmem>>, vector<128x128xbf16>
    %cst_14 = arith.constant dense<0.000000e+00> : vector<128x128xf32>
    %18 = tpu.matmul %16, %17, %cst_14 {dimension_numbers = #tpu.dot_dimension_numbers<[1], [0], [0], [1], [0, 0, 1, 1], [], []>} : vector<128x128xbf16>, vector<128x128xbf16>, vector<128x128xf32> -> vector<128x128xf32>
    %c0_15 = arith.constant 0 : index
    %c0_16 = arith.constant 0 : index
    %19 = vector.load %arg7[%c0_15, %c0_16] : memref<1x128xf32, #tpu.memory_space<vmem>>, vector<1x128xf32>
    %20 = vector.broadcast %19 : vector<1x128xf32> to vector<128x128xf32>
    %21 = arith.addf %18, %20 : vector<128x128xf32>
    %c0_17 = arith.constant 0 : index
    %c0_18 = arith.constant 0 : index
    %22 = vector.load %arg8[%c0_17, %c0_18] : memref<128x128xf32, #tpu.memory_space<vmem>>, vector<128x128xf32>
    tpu.vector_store %arg8[%c0_17, %c0_18], %21 {strides = array<i32>} : memref<128x128xf32, #tpu.memory_space<vmem>>, vector<128x128xf32>,
    return
  }
  func.func @transform_0(%arg0: i32) -> (i32, i32) {
    %c0_i32 = arith.constant 0 : i32
    %c0_i32_0 = arith.constant 0 : i32
    return %arg0, %c0_i32 : i32, i32
  }
  func.func @transform_1(%arg0: i32) -> (i32, i32) {
    %c0_i32 = arith.constant 0 : i32
    %c0_i32_0 = arith.constant 0 : i32
    %c0_i32_1 = arith.constant 0 : i32
    return %c0_i32, %c0_i32_0 : i32, i32
  }
  func.func @transform_2(%arg0: i32) -> (i32, i32) {
    %c0_i32 = arith.constant 0 : i32
    %c0_i32_0 = arith.constant 0 : i32
    %c0_i32_1 = arith.constant 0 : i32
    return %c0_i32, %c0_i32_0 : i32, i32
  }
  func.func @transform_3(%arg0: i32) -> (i32, i32) {
    %c0_i32 = arith.constant 0 : i32
    %c0_i32_0 = arith.constant 0 : i32
    %c0_i32_1 = arith.constant 0 : i32
    return %c0_i32, %c0_i32_0 : i32, i32
  }
  func.func @transform_4(%arg0: i32) -> (i32, i32) {
    %c0_i32 = arith.constant 0 : i32
    %c0_i32_0 = arith.constant 0 : i32
    %c0_i32_1 = arith.constant 0 : i32
    return %c0_i32, %c0_i32_0 : i32, i32
  }
  func.func @transform_5(%arg0: i32) -> (i32, i32) {
    %c0_i32 = arith.constant 0 : i32
    %c0_i32_0 = arith.constant 0 : i32
    %c0_i32_1 = arith.constant 0 : i32
    return %c0_i32, %c0_i32_0 : i32, i32
  }
  func.func @transform_6(%arg0: i32) -> (i32, i32) {
    %c0_i32 = arith.constant 0 : i32
    %c0_i32_0 = arith.constant 0 : i32
    %c0_i32_1 = arith.constant 0 : i32
    return %c0_i32, %c0_i32_0 : i32, i32
  }
  func.func @transform_7(%arg0: i32) -> (i32, i32) {
    %c0_i32 = arith.constant 0 : i32
    %c0_i32_0 = arith.constant 0 : i32
    return %arg0, %c0_i32 : i32, i32
  }
}

</mosaic_0001>

<bundles_post_ra>
// kernel: tpu_custom_call.1
= control target key start
LH: loop header
LB: loop body
LE: loop exit
PB: predicated region body
PF: predicated region fallthrough
CT: control target
= control target key end

     0   :  { %12 = vsyncpa [#allocation3], 0  ;;  %s2708_s0 = inlined_call_operand.hbm [shape: bf16[128,896], index: 0, kind: input, shape index: {}]   ;;  %s2709_s1 = inlined_call_operand.hbm [shape: bf16[896,128], index: 1, kind: input, shape index: {}]   ;;  %s2710_s2 = inlined_call_operand.vmem [shape: f32[1,128], index: 2, kind: input, shape index: {}]   ;;  %s2711_s3 = inlined_call_operand.hbm [shape: bf16[128,128], index: 3, kind: input, shape index: {}]   ;;  %s2712_s4 = inlined_call_operand.vmem [shape: f32[1,128], index: 4, kind: input, shape index: {}]   ;;  %s2713_s5 = inlined_call_operand.hbm [shape: bf16[128,128], index: 5, kind: input, shape index: {}]   ;;  %s2714_s6 = inlined_call_operand.vmem [shape: f32[1,128], index: 6, kind: input, shape index: {}]   ;;  %s2715_s7 = inlined_call_operand.hbm [shape: f32[128,128], index: 7, kind: output, shape index: {}]  }
   0x1   :  { %13 = vsyncpa [#allocation6], 0 }
   0x2   :  { %14 = vsyncpa [#allocation9], 0 }
   0x3   :  { %15 = vsyncpa [#allocation4], 0  ;;  %s2461_s24 = smov [#allocation5]   ;;  %s2343_s28 = scalar_lea.hbm %s2709_s1, 7168 }
   0x4   :  { %s33_s25 = sshll.u32 %s2461_s24, 4  ;;  %p2344_p0 = scmp.ne.s32.totalorder %s2709_s1, %s2343_s28  ;;  %s34_s25 = int_to_ptr.vmem [resolvable:$true] %s33_s25 }
   0x5   :  { %p2347_p1 = scmp.lt.u32.totalorder %s2343_s28, %s2709_s1 }
   0x7   :  { %p2349_p2 = pnand %p2347_p1, %p2344_p0 }
   0x9   :  { %2352 = shalt.err (!%p2349_p2)
}
   0xa   :  { %s2353_s10 = scalar_lea.vmem %s34_s25, 7168  ;;  %p2358_p4 = scmp.lt.s32.totalorder %s34_s25, %s34_s25 }
   0xb   :  { %p2354_p3 = scmp.ne.s32.totalorder %s34_s25, %s2353_s10  ;;  %p2359_p5 = scmp.lt.s32.totalorder %s2353_s10, %s2353_s10 }
   0xd   :  { %p2360_p6 = por %p2359_p5, %p2358_p4 }
   0xf   :  { %p2361_p7 = pnand %p2360_p6, %p2354_p3 }
  0x11   :  { %2364 = shalt.err (!%p2361_p7)
}
  0x12   :  { %s2462_s11 = smov 64   ;;  %s2463_s12 = smov 4  }
  0x13   :  { %39 = dma.hbm_to_vmem [thread:$0]  %s2709_s1, 7168, %s34_s25, [#allocation6], %s2462_s11, %s2462_s11, %s2463_s12  }
  0x14   :  { %s2464_s15 = smov [#allocation2]   ;;  %s2365_s19 = scalar_lea.hbm %s2708_s0, 7168 }
  0x15   :  { %s21_s16 = sshll.u32 %s2464_s15, 4  ;;  %p2366_p8 = scmp.ne.s32.totalorder %s2708_s0, %s2365_s19  ;;  %s22_s16 = int_to_ptr.vmem [resolvable:$true] %s21_s16 }
  0x16   :  { %p2369_p9 = scmp.lt.u32.totalorder %s2365_s19, %s2708_s0 }
  0x18   :  { %p2371_p10 = pnand %p2369_p9, %p2366_p8 }
  0x1a   :  { %2374 = shalt.err (!%p2371_p10)
}
  0x1b   :  { %s2375_s24 = scalar_lea.vmem %s22_s16, 7168  ;;  %p2380_p12 = scmp.lt.s32.totalorder %s22_s16, %s22_s16 }
  0x1c   :  { %p2376_p11 = scmp.ne.s32.totalorder %s22_s16, %s2375_s24  ;;  %p2381_p13 = scmp.lt.s32.totalorder %s2375_s24, %s2375_s24 }
  0x1e   :  { %p2382_p0 = por %p2381_p13, %p2380_p12 }
  0x20   :  { %p2383_p1 = pnand %p2382_p0, %p2376_p11 }
  0x22   :  { %2386 = shalt.err (!%p2383_p1)
}
  0x23   :  { %s2465_s1 = smov 448   ;;  %s2466_s25 = smov 28  }
  0x24   :  { %27 = dma.hbm_to_vmem [thread:$0]  %s2708_s0, 7168, %s22_s16, [#allocation3], %s2465_s1, %s2465_s1, %s2466_s25  }
  0x25   :  { %s2467_s28 = smov [#allocation7]   ;;  %s2468_s30 = smov [#allocation8]  }
  0x26   :  { %s47_s29 = sshll.u32 %s2467_s28, 4  ;;  %s61_s8 = sshll.u32 %s2468_s30, 4  ;;  %s48_s29 = int_to_ptr.vmem [resolvable:$true] %s47_s29  ;;  %s2539_s8 = int_to_ptr.vmem [resolvable:$true] %s61_s8 }
  0x27   :  { %s2387_s13 = scalar_lea.hbm %s2711_s3, 1024 }
  0x28   :  { %p2388_p2 = scmp.ne.s32.totalorder %s2711_s3, %s2387_s13  ;;  %p2391_p3 = scmp.lt.u32.totalorder %s2387_s13, %s2711_s3 }
  0x2a   :  { %p2393_p4 = pnand %p2391_p3, %p2388_p2 }
  0x2c   :  { %2396 = shalt.err (!%p2393_p4)
}
  0x2d   :  { %s2397_s0 = scalar_lea.vmem %s48_s29, 1024  ;;  %p2402_p6 = scmp.lt.s32.totalorder %s48_s29, %s48_s29 }
  0x2e   :  { %p2398_p5 = scmp.ne.s32.totalorder %s48_s29, %s2397_s0  ;;  %p2403_p7 = scmp.lt.s32.totalorder %s2397_s0, %s2397_s0 }
  0x30   :  { %p2404_p8 = por %p2403_p7, %p2402_p6 }
  0x32   :  { %p2405_p9 = pnand %p2404_p8, %p2398_p5 }
  0x34   :  { %2408 = shalt.err (!%p2405_p9)
}
  0x35   :  { %53 = dma.hbm_to_vmem [thread:$0]  %s2711_s3, 1024, %s48_s29, [#allocation6], %s2462_s11, %s2462_s11, %s2463_s12  }
  0x36   :  { %s2409_s22 = scalar_lea.hbm %s2713_s5, 1024 }
  0x37   :  { %p2410_p10 = scmp.ne.s32.totalorder %s2713_s5, %s2409_s22  ;;  %p2413_p11 = scmp.lt.u32.totalorder %s2409_s22, %s2713_s5 }
  0x39   :  { %p2415_p12 = pnand %p2413_p11, %p2410_p10 }
  0x3b   :  { %2418 = shalt.err (!%p2415_p12)
}
  0x3c   :  { %s2419_s26 = scalar_lea.vmem %s2539_s8, 1024  ;;  %p2424_p0 = scmp.lt.s32.totalorder %s2539_s8, %s2539_s8 }
  0x3d   :  { %p2420_p13 = scmp.ne.s32.totalorder %s2539_s8, %s2419_s26  ;;  %p2425_p1 = scmp.lt.s32.totalorder %s2419_s26, %s2419_s26 }
  0x3f   :  { %p2426_p2 = por %p2425_p1, %p2424_p0 }
  0x41   :  { %p2427_p3 = pnand %p2426_p2, %p2420_p13 }
  0x43   :  { %2430 = shalt.err (!%p2427_p3)
}
  0x44   :  { %67 = dma.hbm_to_vmem [thread:$0]  %s2713_s5, 1024, %s2539_s8, [#allocation9], %s2462_s11, %s2462_s11, %s2463_s12  }
  0x45   :  { %2453 = dma.done.wait [#allocation3], 7168  }
  0x46   :  { %2454 = vsyncadd [#allocation3], 4294960128 }
  0x47   :  { %2455 = dma.done.wait [#allocation6], 8192  }
  0x48   :  { %2456 = vsyncadd [#allocation6], 4294959104 }
  0x49   :  { %2457 = dma.done.wait [#allocation9], 1024  }
  0x4a   :  { %2458 = vsyncadd [#allocation9], 4294966272  ;;  %v2191_v0 = vld [vmem:[#allocation5 + $0x40] sm:$0xff]   ;;  %v2195_v4 = vld [vmem:[#allocation5 + $0x48] sm:$0xff]  }
  0x4b   :  { %v2192_v1 = vld [vmem:[#allocation5] sm:$0xff]   ;;  %1828 = vmatprep.subr.bf16.mxu0 %v2191_v0  ;;  %v2196_v5 = vld [vmem:[#allocation5 + $0x8] sm:$0xff]   ;;  %v2199_v8 = vld [vmem:[#allocation5 + $0x50] sm:$0xff]  }
  0x4c   :  { %v2193_v2 = vld [vmem:[#allocation5 + $0xc0] sm:$0xff]   ;;  %1829 = vmatpush3.bf16.msra.mxu0 %v2192_v1  ;;  %v2197_v6 = vld [vmem:[#allocation5 + $0xc8] sm:$0xff]   ;;  %v2200_v9 = vld [vmem:[#allocation5 + $0x10] sm:$0xff]  }
  0x4d   :  { %v2194_v3 = vld [vmem:[#allocation5 + $0x80] sm:$0xff]   ;;  %1892 = vmatprep.subr.bf16.mxu1 %v2193_v2  ;;  %1830 = vmatprep.subr.bf16.mxu0 %v2195_v4  ;;  %v2198_v7 = vld [vmem:[#allocation5 + $0x88] sm:$0xff]   ;;  %v2201_v10 = vld [vmem:[#allocation5 + $0xd0] sm:$0xff]  }
  0x4e   :  { %1893 = vmatpush3.bf16.msra.mxu1 %v2194_v3  ;;  %v2202_v11 = vld [vmem:[#allocation5 + $0x90] sm:$0xff]   ;;  %v2203_v12 = vld [vmem:[#allocation5 + $0x58] sm:$0xff]   ;;  %v2207_v16 = vld [vmem:[#allocation5 + $0x60] sm:$0xff]  }
  0x4f   :  { %1894 = vmatprep.subr.bf16.mxu1 %v2197_v6  ;;  %v2204_v13 = vld [vmem:[#allocation5 + $0x18] sm:$0xff]   ;;  %v2208_v17 = vld [vmem:[#allocation5 + $0x20] sm:$0xff]   ;;  %v2211_v20 = vld [vmem:[#allocation5 + $0x68] sm:$0xff]  }
  0x50   :  { %1831 = vmatpush3.bf16.msra.mxu0 %v2196_v5  ;;  %v2205_v14 = vld [vmem:[#allocation5 + $0xd8] sm:$0xff]   ;;  %v2209_v18 = vld [vmem:[#allocation5 + $0xe0] sm:$0xff]   ;;  %v2212_v21 = vld [vmem:[#allocation5 + $0x28] sm:$0xff]  }
  0x51   :  { %1832 = vmatprep.subr.bf16.mxu0 %v2199_v8  ;;  %v2206_v15 = vld [vmem:[#allocation5 + $0x98] sm:$0xff]   ;;  %v2210_v19 = vld [vmem:[#allocation5 + $0xa0] sm:$0xff]   ;;  %v2213_v22 = vld [vmem:[#allocation5 + $0xe8] sm:$0xff]  }
  0x52   :  { %1895 = vmatpush3.bf16.msra.mxu1 %v2198_v7  ;;  %v2214_v23 = vld [vmem:[#allocation5 + $0xa8] sm:$0xff]   ;;  %v2215_v24 = vld [vmem:[#allocation5 + $0x70] sm:$0xff]   ;;  %v2219_v28 = vld [vmem:[#allocation5 + $0x78] sm:$0xff]  }
  0x53   :  { %1896 = vmatprep.subr.bf16.mxu1 %v2201_v10  ;;  %v2216_v25 = vld [vmem:[#allocation5 + $0x30] sm:$0xff]   ;;  %v2220_v29 = vld [vmem:[#allocation5 + $0x38] sm:$0xff]   ;;  %v2224_v32 = vld [vmem:[#allocation2 + $0x4] ss:$28 sps:$4 sm:$0xff]  }
  0x54   :  { %1833 = vmatpush3.bf16.msra.mxu0 %v2200_v9  ;;  %v2217_v26 = vld [vmem:[#allocation5 + $0xf0] sm:$0xff]   ;;  %v2221_v30 = vld [vmem:[#allocation5 + $0xf8] sm:$0xff]   ;;  %922 = vmatprep.mubr.bf16.mxu0 %v2224_v32  ;;  %v2226_v34 = vld [vmem:[#allocation5 + $0x140] sm:$0xff]  }
  0x55   :  { %1834 = vmatprep.subr.bf16.mxu0 %v2203_v12  ;;  %v2218_v27 = vld [vmem:[#allocation5 + $0xb0] sm:$0xff]   ;;  %v2222_v31 = vld [vmem:[#allocation2] ss:$28 sps:$4 sm:$0xff]   ;;  %v2227_v35 = vld [vmem:[#allocation2 + $0x8] ss:$28 sps:$4 sm:$0xff]  }
  0x56   :  { %1897 = vmatpush3.bf16.msra.mxu1 %v2202_v11  ;;  %v2225_v33 = vld [vmem:[#allocation5 + $0xb8] sm:$0xff]   ;;  %v2229_v36 = vld [vmem:[#allocation2 + $0xc] ss:$28 sps:$4 sm:$0xff]   ;;  %v2230_v37 = vld [vmem:[#allocation5 + $0x100] sm:$0xff]  }
  0x57   :  { %1898 = vmatprep.subr.bf16.mxu1 %v2205_v14  ;;  %1019 = vmatprep.mubr.bf16.mxu1 %v2229_v36  ;;  %v2231_v38 = vld [vmem:[#allocation2 + $0x3c] ss:$28 sps:$4 sm:$0xff]   ;;  %v2234_v40 = vld [vmem:[#allocation5 + $0x148] sm:$0xff]   ;;  %v2235_v41 = vld [vmem:[#allocation2 + $0x44] ss:$28 sps:$4 sm:$0xff]  }
  0x58   :  { %1835 = vmatpush3.bf16.msra.mxu0 %v2204_v13  ;;  %v2233_v39 = vld [vmem:[#allocation2 + $0x38] ss:$28 sps:$4 sm:$0xff]   ;;  %v2237_v42 = vld [vmem:[#allocation5 + $0x108] sm:$0xff]   ;;  %v2238_v43 = vld [vmem:[#allocation2 + $0x40] ss:$28 sps:$4 sm:$0xff]  }
  0x59   :  { %1836 = vmatprep.subr.bf16.mxu0 %v2207_v16  ;;  %v2239_v44 = vld [vmem:[#allocation2 + $0x74] ss:$28 sps:$4 sm:$0xff]   ;;  %v2243_v46 = vld [vmem:[#allocation2 + $0x7c] ss:$28 sps:$4 sm:$0xff]   ;;  %v2247_v49 = vld [vmem:[#allocation2 + $0xac] ss:$28 sps:$4 sm:$0xff]  }
  0x5a   :  { %1899 = vmatpush3.bf16.msra.mxu1 %v2206_v15  ;;  %v2242_v45 = vld [vmem:[#allocation5 + $0x150] sm:$0xff]   ;;  %v2250_v50 = vld [vmem:[#allocation5 + $0x158] sm:$0xff]   ;;  %v2258_v54 = vld [vmem:[#allocation5 + $0x160] sm:$0xff]  }
  0x5b   :  { %1900 = vmatprep.subr.bf16.mxu1 %v2209_v18  ;;  %v2245_v47 = vld [vmem:[#allocation5 + $0x110] sm:$0xff]   ;;  %v2253_v52 = vld [vmem:[#allocation5 + $0x118] sm:$0xff]   ;;  %v2249_v55 = vld [vmem:[#allocation2 + $0xa8] ss:$28 sps:$4 sm:$0xff]  }
  0x5c   :  { %1837 = vmatpush3.bf16.msra.mxu0 %v2208_v17  ;;  %v2241_v48 = vld [vmem:[#allocation2 + $0x70] ss:$28 sps:$4 sm:$0xff]   ;;  %v2246_v51 = vld [vmem:[#allocation2 + $0x78] ss:$28 sps:$4 sm:$0xff]   ;;  %v2261_v56 = vld [vmem:[#allocation5 + $0x120] sm:$0xff]  }
  0x5d   :  { %1838 = vmatprep.subr.bf16.mxu0 %v2211_v20  ;;  %v2251_v53 = vld [vmem:[#allocation2 + $0xb4] ss:$28 sps:$4 sm:$0xff]   ;;  %v2255_v57 = vld [vmem:[#allocation2 + $0xe4] ss:$28 sps:$4 sm:$0xff]   ;;  %v2259_v60 = vld [vmem:[#allocation2 + $0xec] ss:$28 sps:$4 sm:$0xff]  }
  0x5e   :  { %1901 = vmatpush3.bf16.msra.mxu1 %v2210_v19  ;;  %v2263_v58 = vld [vmem:[#allocation5 + $0x180] sm:$0xff]   ;;  %v2254_v59 = vld [vmem:[#allocation2 + $0xb0] ss:$28 sps:$4 sm:$0xff]   ;;  %v2264_v3 = vld [vmem:[#allocation2 + $0x11c] ss:$28 sps:$4 sm:$0xff]  }
  0x5f   :  { %1902 = vmatprep.subr.bf16.mxu1 %v2213_v22  ;;  %v2267_v61 = vld [vmem:[#allocation5 + $0x168] sm:$0xff]   ;;  %v2273_v0 = vld [vmem:[#allocation5 + $0x190] sm:$0xff]   ;;  %v2257_v1 = vld [vmem:[#allocation2 + $0xe0] ss:$28 sps:$4 sm:$0xff]  }
  0x60   :  { %1839 = vmatpush3.bf16.msra.mxu0 %v2212_v21  ;;  %v2268_v62 = vld [vmem:[#allocation5 + $0x188] sm:$0xff]   ;;  %v2277_v4 = vld [vmem:[#allocation5 + $0x170] sm:$0xff]   ;;  %v2278_v5 = vld [vmem:[#allocation5 + $0x198] sm:$0xff]  }
  0x61   :  { %1840 = vmatprep.subr.bf16.mxu0 %v2215_v24  ;;  %v2271_v63 = vld [vmem:[#allocation5 + $0x128] sm:$0xff]   ;;  %v2269_v6 = vld [vmem:[#allocation2 + $0x124] ss:$28 sps:$4 sm:$0xff]   ;;  %v2281_v7 = vld [vmem:[#allocation5 + $0x130] sm:$0xff]  }
  0x62   :  { %1903 = vmatpush3.bf16.msra.mxu1 %v2214_v23  ;;  %v2262_v2 = vld [vmem:[#allocation2 + $0xe8] ss:$28 sps:$4 sm:$0xff]   ;;  %v2266_v9 = vld [vmem:[#allocation2 + $0x118] ss:$28 sps:$4 sm:$0xff]   ;;  %v2272_v11 = vld [vmem:[#allocation2 + $0x120] ss:$28 sps:$4 sm:$0xff]  }
  0x63   :  { %1904 = vmatprep.subr.bf16.mxu1 %v2217_v26  ;;  %v2283_v8 = vld [vmem:[#allocation5 + $0x1a0] sm:$0xff]   ;;  %v2287_v10 = vld [vmem:[#allocation5 + $0x178] sm:$0xff]   ;;  %v2274_v12 = vld [vmem:[#allocation2 + $0x154] ss:$28 sps:$4 sm:$0xff]  }
  0x64   :  { %1841 = vmatpush3.bf16.msra.mxu0 %v2216_v25  ;;  %v2288_v13 = vld [vmem:[#allocation5 + $0x1a8] sm:$0xff]   ;;  %v2291_v14 = vld [vmem:[#allocation5 + $0x138] sm:$0xff]   ;;  %v2293_v16 = vld [vmem:[#allocation5 + $0x1b0] sm:$0xff]  }
  0x65   :  { %1842 = vmatprep.subr.bf16.mxu0 %v2219_v28  ;;  %v2279_v15 = vld [vmem:[#allocation2 + $0x15c] ss:$28 sps:$4 sm:$0xff]   ;;  %v2276_v17 = vld [vmem:[#allocation2 + $0x150] ss:$28 sps:$4 sm:$0xff]   ;;  %v2286_v22 = vld [vmem:[#allocation2 + $0x188] ss:$28 sps:$4 sm:$0xff]  }
  0x66   :  { %1905 = vmatpush3.bf16.msra.mxu1 %v2218_v27  ;;  %v2284_v18 = vld [vmem:[#allocation2 + $0x18c] ss:$28 sps:$4 sm:$0xff]   ;;  %v2297_v19 = vld [vmem:[#allocation5 + $0x1b8] sm:$0xff]   ;;  %v2289_v21 = vld [vmem:[#allocation2 + $0x194] ss:$28 sps:$4 sm:$0xff]  }
  0x67   :  { %1906 = vmatprep.subr.bf16.mxu1 %v2221_v30  ;;  %v2282_v20 = vld [vmem:[#allocation2 + $0x158] ss:$28 sps:$4 sm:$0xff]   ;;  %v2292_v24 = vld [vmem:[#allocation2 + $0x190] ss:$28 sps:$4 sm:$0xff]   ;;  %v2302_v30 = vld [vmem:[#allocation2 + $0x48] ss:$28 sps:$4 sm:$0xff]  }
  0x68   :  { %1843 = vmatpush3.bf16.msra.mxu0 %v2220_v29  ;;  %v2296_v23 = vld [vmem:[#allocation2 + $0x14] ss:$28 sps:$4 sm:$0xff]   ;;  %v2300_v27 = vld [vmem:[#allocation2 + $0x4c] ss:$28 sps:$4 sm:$0xff]   ;;  %v2307_v32 = vld [vmem:[#allocation2 + $0xc0] ss:$28 sps:$4 sm:$0xff]  }
  0x69   :  { %1956 = vmatprep.subr.bf16.mxu0 %v2226_v34  ;;  %v2298_v25 = vld [vmem:[#allocation2 + $0x18] ss:$28 sps:$4 sm:$0xff]   ;;  %v2294_v26 = vld [vmem:[#allocation2 + $0x10] ss:$28 sps:$4 sm:$0xff]   ;;  %v2306_v29 = vld [vmem:[#allocation2 + $0x88] ss:$28 sps:$4 sm:$0xff]  }
  0x6a   :  { %1907 = vmatpush3.bf16.msra.mxu1 %v2225_v33  ;;  %v2299_v28 = vld [vmem:[#allocation2 + $0x50] ss:$28 sps:$4 sm:$0xff]   ;;  %v2314_v33 = vld [vmem:[#allocation2 + $0xf8] ss:$28 sps:$4 sm:$0xff]   ;;  %v2305_v34 = vld [vmem:[#allocation2 + $0x80] ss:$28 sps:$4 sm:$0xff]  }
  0x6b   :  { %923 = vmatmul.mubr.bf16.vlgmr.msra.gmra.mrb[0].mxu0 %v2222_v31  ;;  %2068 = vmatprep.subr.bf16.mxu1 %v2263_v58  ;;  %v2303_v31 = vld [vmem:[#allocation2 + $0x84] ss:$28 sps:$4 sm:$0xff]   ;;  %v2315_v36 = vld [vmem:[#allocation2 + $0x130] ss:$28 sps:$4 sm:$0xff]  }
  0x6c   :  { %1957 = vmatpush3.bf16.msra.mxu0 %v2230_v37  ;;  %930 = vmatprep.mubr.bf16.mxu0 %v2231_v38  ;;  %v2322_v37 = vld [vmem:[#allocation2 + $0x168] ss:$28 sps:$4 sm:$0xff]   ;;  %v2310_v38 = vld [vmem:[#allocation2 + $0xb8] ss:$28 sps:$4 sm:$0xff]  }
  0x6d   :  { %1020 = vmatmul.mubr.bf16.vlgmr.msra.gmra.mrb[0].mxu1 %v2227_v35  ;;  %1958 = vmatprep.subr.bf16.mxu0 %v2234_v40  ;;  %v2308_v35 = vld [vmem:[#allocation2 + $0xbc] ss:$28 sps:$4 sm:$0xff]  }
  0x6e   :  { %1027 = vmatprep.mubr.bf16.mxu1 %v2235_v41  ;;  %2069 = vmatpush3.bf16.msra.mxu1 %v2263_v58  ;;  %v2323_v40 = vld [vmem:[#allocation2 + $0x1a0] ss:$28 sps:$4 sm:$0xff]   ;;  %v2313_v41 = vld [vmem:[#allocation2 + $0xf0] ss:$28 sps:$4 sm:$0xff]  }
  0x6f   :  { %2070 = vmatprep.subr.bf16.mxu1 %v2268_v62 }
  0x70   :  { %1959 = vmatpush3.bf16.msra.mxu0 %v2237_v42  ;;  %v2316_v42 = vld [vmem:[#allocation2 + $0x12c] ss:$28 sps:$4 sm:$0xff]  }
  0x71   :  { %1960 = vmatprep.subr.bf16.mxu0 %v2242_v45  ;;  %v2321_v45 = vld [vmem:[#allocation2 + $0x160] ss:$28 sps:$4 sm:$0xff]  }
  0x72   :  { %2071 = vmatpush3.bf16.msra.mxu1 %v2268_v62 }
  0x73   :  { %931 = vmatmul.mubr.bf16.gmra.mrb[4].mxu0 %v2233_v39  ;;  %2072 = vmatprep.subr.bf16.mxu1 %v2273_v0  ;;  %v2311_v39 = vld [vmem:[#allocation2 + $0xf4] ss:$28 sps:$4 sm:$0xff]  }
  0x74   :  { %938 = vmatprep.mubr.bf16.mxu0 %v2239_v44  ;;  %1961 = vmatpush3.bf16.msra.mxu0 %v2245_v47  ;;  %v2319_v44 = vld [vmem:[#allocation2 + $0x164] ss:$28 sps:$4 sm:$0xff]   ;;  %v2326_v47 = vld [vmem:[#allocation2 + $0x198] ss:$28 sps:$4 sm:$0xff]  }
  0x75   :  { %1028 = vmatmul.mubr.bf16.gmra.mrb[4].mxu1 %v2238_v43  ;;  %1962 = vmatprep.subr.bf16.mxu0 %v2250_v50  ;;  %v2318_v43 = vld [vmem:[#allocation2 + $0x128] ss:$28 sps:$4 sm:$0xff]   ;;  %v2329_v50 = vld [vmem:[#allocation7 + $0x10] sm:$0xff]  }
  0x76   :  { %1035 = vmatprep.mubr.bf16.mxu1 %v2243_v46  ;;  %2073 = vmatpush3.bf16.msra.mxu1 %v2273_v0  ;;  %v2324_v46 = vld [vmem:[#allocation2 + $0x19c] ss:$28 sps:$4 sm:$0xff]  }
  0x77   :  { %2074 = vmatprep.subr.bf16.mxu1 %v2278_v5 }
  0x78   :  { %1963 = vmatpush3.bf16.msra.mxu0 %v2253_v52  ;;  %v2331_v52 = vld [vmem:[#allocation7 + $0x20] sm:$0xff]  }
  0x79   :  { %1964 = vmatprep.subr.bf16.mxu0 %v2258_v54  ;;  %v2333_v54 = vld [vmem:[#allocation7 + $0x30] sm:$0xff]  }
  0x7a   :  { %2075 = vmatpush3.bf16.msra.mxu1 %v2278_v5 }
  0x7b   :  { %939 = vmatmul.mubr.bf16.gmra.mrb[8].mxu0 %v2241_v48  ;;  %2076 = vmatprep.subr.bf16.mxu1 %v2283_v8  ;;  %v2327_v48 = vld [vmem:[#allocation7] sm:$0xff]  }
  0x7c   :  { %946 = vmatprep.mubr.bf16.mxu0 %v2247_v49  ;;  %1965 = vmatpush3.bf16.msra.mxu0 %v2261_v56  ;;  %v2328_v49 = vld [vmem:[#allocation7 + $0x8] sm:$0xff]  }
  0x7d   :  { %1036 = vmatmul.mubr.bf16.gmra.mrb[8].mxu1 %v2246_v51  ;;  %1966 = vmatprep.subr.bf16.mxu0 %v2267_v61  ;;  %v2330_v51 = vld [vmem:[#allocation7 + $0x18] sm:$0xff]  }
  0x7e   :  { %1043 = vmatprep.mubr.bf16.mxu1 %v2251_v53  ;;  %2077 = vmatpush3.bf16.msra.mxu1 %v2283_v8  ;;  %v2332_v53 = vld [vmem:[#allocation7 + $0x28] sm:$0xff]  }
  0x7f   :  { %2078 = vmatprep.subr.bf16.mxu1 %v2288_v13 }
  0x80   :  { %1967 = vmatpush3.bf16.msra.mxu0 %v2271_v63 }
  0x81   :  { %1968 = vmatprep.subr.bf16.mxu0 %v2277_v4 }
  0x82   :  { %2079 = vmatpush3.bf16.msra.mxu1 %v2288_v13 }
  0x83   :  { %947 = vmatmul.mubr.bf16.gmra.mrb[12].mxu0 %v2249_v55  ;;  %2080 = vmatprep.subr.bf16.mxu1 %v2293_v16  ;;  %v2334_v55 = vld [vmem:[#allocation7 + $0x38] sm:$0xff]  }
  0x84   :  { %954 = vmatprep.mubr.bf16.mxu0 %v2255_v57  ;;  %1969 = vmatpush3.bf16.msra.mxu0 %v2281_v7  ;;  %v2579_v57 = vld [vmem:[%s2710_s2] ss:$0 sm:$0xff]  ;;  %v2585_v7 = vld [vmem:[#allocation8 + $0x8] sm:$0xff]  }
  0x85   :  { %1044 = vmatmul.mubr.bf16.gmra.mrb[12].mxu1 %v2254_v59  ;;  %1970 = vmatprep.subr.bf16.mxu0 %v2287_v10 }
  0x86   :  { %1051 = vmatprep.mubr.bf16.mxu1 %v2259_v60  ;;  %2081 = vmatpush3.bf16.msra.mxu1 %v2293_v16 }
  0x87   :  { %2082 = vmatprep.subr.bf16.mxu1 %v2297_v19 }
  0x88   :  { %1971 = vmatpush3.bf16.msra.mxu0 %v2291_v14 }
  0x8a   :  { %2083 = vmatpush3.bf16.msra.mxu1 %v2297_v19 }
  0x8b   :  { %955 = vmatmul.mubr.bf16.gmra.mrb[16].mxu0 %v2257_v1  ;;  %2100 = vmatprep.subr.bf16.mxu1 %v2327_v48 }
  0x8c   :  { %962 = vmatprep.mubr.bf16.mxu0 %v2264_v3 }
  0x8d   :  { %1052 = vmatmul.mubr.bf16.gmra.mrb[16].mxu1 %v2262_v2 }
  0x8e   :  { %1059 = vmatprep.mubr.bf16.mxu1 %v2269_v6  ;;  %v2583_v6 = vld [vmem:[#allocation8] sm:$0xff]  }
  0x8f   :  { %2132 = vmatprep.subr.bf16.mxu0 %v2583_v6 }
  0x93   :  { %963 = vmatmul.mubr.bf16.gmra.mrb[20].mxu0 %v2266_v9 }
  0x94   :  { %970 = vmatprep.mubr.bf16.mxu0 %v2274_v12 }
  0x95   :  { %1060 = vmatmul.mubr.bf16.gmra.mrb[20].mxu1 %v2272_v11 }
  0x96   :  { %1067 = vmatprep.mubr.bf16.mxu1 %v2279_v15  ;;  %v2595_v15 = vld [vmem:[#allocation8 + $0x10] sm:$0xff]  }
  0x9b   :  { %971 = vmatmul.mubr.bf16.gmra.mrb[24].mxu0 %v2276_v17 }
  0x9c   :  { %978 = vmatprep.mubr.bf16.mxu0 %v2284_v18 }
  0x9d   :  { %1068 = vmatmul.mubr.bf16.gmra.mrb[24].mxu1 %v2282_v20 }
  0x9e   :  { %1075 = vmatprep.mubr.bf16.mxu1 %v2289_v21 }
  0xa3   :  { %979 = vmatmul.mubr.bf16.gmra.mrb[28].mxu0 %v2286_v22 }
  0xa4   :  { %1116 = vmatprep.mubr.bf16.mxu0 %v2296_v23 }
  0xa5   :  { %1076 = vmatmul.mubr.bf16.gmra.mrb[28].mxu1 %v2292_v24 }
  0xa6   :  { %2084 = vmatprep.mubr.bf16.mxu1 %v2298_v25  ;;  %v2601_v25 = vld [vmem:[#allocation8 + $0x18] sm:$0xff]  }
  0xab   :  { %1117 = vmatmul.mubr.bf16.vlgmr.msra.gmra.mrb[32].mxu0 %v2294_v26 }
  0xac   :  { %1124 = vmatprep.mubr.bf16.mxu0 %v2300_v27  ;;  %2133 = vmatpush3.bf16.msra.mxu0 %v2583_v6 }
  0xad   :  { %2085 = vmatmul.mubr.bf16.vlgmr.msra.gmra.mrb[32].mxu1 %v2299_v28  ;;  %2134 = vmatprep.subr.bf16.mxu0 %v2585_v7 }
  0xae   :  { %2088 = vmatprep.mubr.bf16.mxu1 %v2306_v29  ;;  %2101 = vmatpush3.bf16.msra.mxu1 %v2327_v48 }
  0xaf   :  { %2102 = vmatprep.subr.bf16.mxu1 %v2328_v49 }
  0xb0   :  { %2135 = vmatpush3.bf16.msra.mxu0 %v2585_v7 }
  0xb1   :  { %2136 = vmatprep.subr.bf16.mxu0 %v2595_v15 }
  0xb2   :  { %2103 = vmatpush3.bf16.msra.mxu1 %v2328_v49 }
  0xb3   :  { %1125 = vmatmul.mubr.bf16.gmra.mrb[36].mxu0 %v2302_v30  ;;  %2104 = vmatprep.subr.bf16.mxu1 %v2329_v50 }
  0xb4   :  { %1132 = vmatprep.mubr.bf16.mxu0 %v2303_v31  ;;  %2137 = vmatpush3.bf16.msra.mxu0 %v2595_v15 }
  0xb5   :  { %2089 = vmatmul.mubr.bf16.gmra.mrb[36].mxu1 %v2307_v32  ;;  %2138 = vmatprep.subr.bf16.mxu0 %v2601_v25 }
  0xb6   :  { %2092 = vmatprep.mubr.bf16.mxu1 %v2314_v33  ;;  %2105 = vmatpush3.bf16.msra.mxu1 %v2329_v50  ;;  %v2609_v33 = vld [vmem:[#allocation8 + $0x20] sm:$0xff]  }
  0xb7   :  { %2106 = vmatprep.subr.bf16.mxu1 %v2330_v51 }
  0xb8   :  { %2139 = vmatpush3.bf16.msra.mxu0 %v2601_v25 }
  0xb9   :  { %2140 = vmatprep.subr.bf16.mxu0 %v2609_v33 }
  0xba   :  { %2107 = vmatpush3.bf16.msra.mxu1 %v2330_v51 }
  0xbb   :  { %1133 = vmatmul.mubr.bf16.gmra.mrb[40].mxu0 %v2305_v34  ;;  %2108 = vmatprep.subr.bf16.mxu1 %v2331_v52 }
  0xbc   :  { %1140 = vmatprep.mubr.bf16.mxu0 %v2308_v35  ;;  %2141 = vmatpush3.bf16.msra.mxu0 %v2609_v33 }
  0xbd   :  { %2093 = vmatmul.mubr.bf16.gmra.mrb[40].mxu1 %v2315_v36 }
  0xbe   :  { %2096 = vmatprep.mubr.bf16.mxu1 %v2322_v37  ;;  %2109 = vmatpush3.bf16.msra.mxu1 %v2331_v52 }
  0xbf   :  { %2110 = vmatprep.subr.bf16.mxu1 %v2332_v53 }
  0xc2   :  { %2111 = vmatpush3.bf16.msra.mxu1 %v2332_v53 }
  0xc3   :  { %1141 = vmatmul.mubr.bf16.gmra.mrb[44].mxu0 %v2310_v38  ;;  %2112 = vmatprep.subr.bf16.mxu1 %v2333_v54 }
  0xc4   :  { %1148 = vmatprep.mubr.bf16.mxu0 %v2311_v39 }
  0xc5   :  { %2097 = vmatmul.mubr.bf16.gmra.mrb[44].mxu1 %v2323_v40 }
  0xc6   :  { %2113 = vmatpush3.bf16.msra.mxu1 %v2333_v54 }
  0xc7   :  { %2114 = vmatprep.subr.bf16.mxu1 %v2334_v55 }
  0xca   :  { %2115 = vmatpush3.bf16.msra.mxu1 %v2334_v55 }
  0xcb   :  { %1149 = vmatmul.mubr.bf16.gmra.mrb[48].mxu0 %v2313_v41  ;;  %2164 = vmatprep.subr.bf16.mxu1 %v2583_v6 }
  0xcc   :  { %1156 = vmatprep.mubr.bf16.mxu0 %v2316_v42 }
  0xd3   :  { %1157 = vmatmul.mubr.bf16.gmra.mrb[52].mxu0 %v2318_v43  ;;  %v2615_v43 = vld [vmem:[#allocation8 + $0x28] sm:$0xff]  }
  0xd4   :  { %1164 = vmatprep.mubr.bf16.mxu0 %v2319_v44  ;;  %2142 = vmatprep.subr.bf16.mxu0 %v2615_v43 }
  0xd5   :  { %2143 = vmatpush3.bf16.msra.mxu0 %v2615_v43 }
  0xdb   :  { %1165 = vmatmul.mubr.bf16.gmra.mrb[56].mxu0 %v2321_v45 }
  0xdc   :  { %1172 = vmatprep.mubr.bf16.mxu0 %v2324_v46 }
  0xe3   :  { %1173 = vmatmul.mubr.bf16.gmra.mrb[60].mxu0 %v2326_v47 }
 0x13e   :  { %v1844_v56 = vpop.f32.mrb[0].mxu0 }
 0x13f   :  { %v1845_v58 = vpop.f32.mrb[1].mxu0 }
 0x140   :  { %v1846_v59 = vadd.f32 %v1845_v58, %v1844_v56  ;;  %v1847_v60 = vpop.f32.mrb[2].mxu0  ;;  %v1908_v61 = vpop.f32.mrb[0].mxu1 }
 0x141   :  { %v1848_v62 = vpop.f32.mrb[3].mxu0  ;;  %v1909_v1 = vpop.f32.mrb[1].mxu1 }
 0x142   :  { %v925_v63 = vadd.f32 %v1846_v59, %v2579_v57  ;;  %v1849_v0 = vadd.f32 %v1848_v62, %v1847_v60  ;;  %v1910_v2 = vadd.f32 %v1909_v1, %v1908_v61  ;;  %v1911_v3 = vpop.f32.mrb[2].mxu1 }
 0x143   :  { %v1912_v5 = vpop.f32.mrb[3].mxu1 }
 0x144   :  { %v928_v4 = vadd.f32 %v1849_v0, %v2579_v57  ;;  %v2587_v8 = vadd.f32 %v1910_v2, %v925_v63  ;;  %v1913_v9 = vadd.f32 %v1912_v5, %v1911_v3 }
 0x146   :  { %v1850_v10 = vpop.f32.mrb[4].mxu0  ;;  %v2591_v11 = vadd.f32 %v1913_v9, %v928_v4 }
 0x147   :  { %v1851_v12 = vpop.f32.mrb[5].mxu0 }
 0x148   :  { %v1852_v13 = vadd.f32 %v1851_v12, %v1850_v10  ;;  %v1853_v14 = vpop.f32.mrb[6].mxu0  ;;  %v1914_v16 = vpop.f32.mrb[4].mxu1 }
 0x149   :  { %v1854_v17 = vpop.f32.mrb[7].mxu0  ;;  %v1915_v20 = vpop.f32.mrb[5].mxu1 }
 0x14a   :  { %v933_v18 = vadd.f32 %v1852_v13, %v2579_v57  ;;  %v1855_v19 = vadd.f32 %v1854_v17, %v1853_v14  ;;  %v1916_v21 = vadd.f32 %v1915_v20, %v1914_v16  ;;  %v1917_v22 = vpop.f32.mrb[6].mxu1 }
 0x14b   :  { %v1918_v24 = vpop.f32.mrb[7].mxu1 }
 0x14c   :  { %v936_v23 = vadd.f32 %v1855_v19, %v2579_v57  ;;  %v2603_v26 = vadd.f32 %v1916_v21, %v933_v18  ;;  %v1919_v27 = vadd.f32 %v1918_v24, %v1917_v22 }
 0x14e   :  { %v1856_v28 = vpop.f32.mrb[8].mxu0  ;;  %v2605_v29 = vadd.f32 %v1919_v27, %v936_v23 }
 0x14f   :  { %v1857_v30 = vpop.f32.mrb[9].mxu0 }
 0x150   :  { %v1858_v31 = vadd.f32 %v1857_v30, %v1856_v28  ;;  %v1859_v32 = vpop.f32.mrb[10].mxu0  ;;  %v1920_v34 = vpop.f32.mrb[8].mxu1 }
 0x151   :  { %v1860_v35 = vpop.f32.mrb[11].mxu0  ;;  %v1921_v38 = vpop.f32.mrb[9].mxu1 }
 0x152   :  { %v941_v36 = vadd.f32 %v1858_v31, %v2579_v57  ;;  %v1861_v37 = vadd.f32 %v1860_v35, %v1859_v32  ;;  %v1922_v39 = vadd.f32 %v1921_v38, %v1920_v34  ;;  %v1923_v40 = vpop.f32.mrb[10].mxu1 }
 0x153   :  { %v1924_v42 = vpop.f32.mrb[11].mxu1 }
 0x154   :  { %v944_v41 = vadd.f32 %v1861_v37, %v2579_v57  ;;  %v2617_v44 = vadd.f32 %v1922_v39, %v941_v36  ;;  %v1925_v45 = vadd.f32 %v1924_v42, %v1923_v40 }
 0x156   :  { %v1862_v46 = vpop.f32.mrb[12].mxu0  ;;  %v2619_v47 = vadd.f32 %v1925_v45, %v944_v41 }
 0x157   :  { %v1863_v48 = vpop.f32.mrb[13].mxu0 }
 0x158   :  { %v1864_v49 = vadd.f32 %v1863_v48, %v1862_v46  ;;  %v1865_v50 = vpop.f32.mrb[14].mxu0  ;;  %v1926_v51 = vpop.f32.mrb[12].mxu1 }
 0x159   :  { %v1866_v52 = vpop.f32.mrb[15].mxu0  ;;  %v1927_v55 = vpop.f32.mrb[13].mxu1 }
 0x15a   :  { %v949_v53 = vadd.f32 %v1864_v49, %v2579_v57  ;;  %v1867_v54 = vadd.f32 %v1866_v52, %v1865_v50  ;;  %v1928_v56 = vadd.f32 %v1927_v55, %v1926_v51  ;;  %v1929_v58 = vpop.f32.mrb[14].mxu1 }
 0x15b   :  { %v1930_v60 = vpop.f32.mrb[15].mxu1 }
 0x15c   :  { %v952_v59 = vadd.f32 %v1867_v54, %v2579_v57  ;;  %v2626_v61 = vadd.f32 %v1928_v56, %v949_v53  ;;  %v1931_v62 = vadd.f32 %v1930_v60, %v1929_v58 }
 0x15e   :  { %v1868_v63 = vpop.f32.mrb[16].mxu0  ;;  %v2628_v0 = vadd.f32 %v1931_v62, %v952_v59 }
 0x15f   :  { %v1869_v1 = vpop.f32.mrb[17].mxu0 }
 0x160   :  { %v1870_v2 = vadd.f32 %v1869_v1, %v1868_v63  ;;  %v1871_v3 = vpop.f32.mrb[18].mxu0  ;;  %v1932_v4 = vpop.f32.mrb[16].mxu1 }
 0x161   :  { %v1872_v5 = vpop.f32.mrb[19].mxu0  ;;  %v1933_v12 = vpop.f32.mrb[17].mxu1 }
 0x162   :  { %v957_v9 = vadd.f32 %v1870_v2, %v2579_v57  ;;  %v1873_v10 = vadd.f32 %v1872_v5, %v1871_v3  ;;  %v1934_v13 = vadd.f32 %v1933_v12, %v1932_v4  ;;  %v1935_v14 = vpop.f32.mrb[18].mxu1 }
 0x163   :  { %v1936_v17 = vpop.f32.mrb[19].mxu1 }
 0x164   :  { %v960_v16 = vadd.f32 %v1873_v10, %v2579_v57  ;;  %v2632_v18 = vadd.f32 %v1934_v13, %v957_v9  ;;  %v1937_v19 = vadd.f32 %v1936_v17, %v1935_v14 }
 0x166   :  { %v1874_v20 = vpop.f32.mrb[20].mxu0  ;;  %v2634_v21 = vadd.f32 %v1937_v19, %v960_v16 }
 0x167   :  { %v1875_v22 = vpop.f32.mrb[21].mxu0 }
 0x168   :  { %v1876_v23 = vadd.f32 %v1875_v22, %v1874_v20  ;;  %v1877_v24 = vpop.f32.mrb[22].mxu0  ;;  %v1938_v27 = vpop.f32.mrb[20].mxu1 }
 0x169   :  { %v1878_v28 = vpop.f32.mrb[23].mxu0  ;;  %v1939_v32 = vpop.f32.mrb[21].mxu1 }
 0x16a   :  { %v965_v30 = vadd.f32 %v1876_v23, %v2579_v57  ;;  %v1879_v31 = vadd.f32 %v1878_v28, %v1877_v24  ;;  %v1940_v34 = vadd.f32 %v1939_v32, %v1938_v27  ;;  %v1941_v35 = vpop.f32.mrb[22].mxu1 }
 0x16b   :  { %v1942_v37 = vpop.f32.mrb[23].mxu1 }
 0x16c   :  { %v968_v36 = vadd.f32 %v1879_v31, %v2579_v57  ;;  %v2638_v38 = vadd.f32 %v1940_v34, %v965_v30  ;;  %v1943_v39 = vadd.f32 %v1942_v37, %v1941_v35 }
 0x16e   :  { %v1880_v40 = vpop.f32.mrb[24].mxu0  ;;  %v2640_v41 = vadd.f32 %v1943_v39, %v968_v36 }
 0x16f   :  { %v1881_v42 = vpop.f32.mrb[25].mxu0 }
 0x170   :  { %v1882_v45 = vadd.f32 %v1881_v42, %v1880_v40  ;;  %v1883_v46 = vpop.f32.mrb[26].mxu0  ;;  %v1944_v48 = vpop.f32.mrb[24].mxu1 }
 0x171   :  { %v1884_v49 = vpop.f32.mrb[27].mxu0  ;;  %v1945_v52 = vpop.f32.mrb[25].mxu1 }
 0x172   :  { %v973_v50 = vadd.f32 %v1882_v45, %v2579_v57  ;;  %v1885_v51 = vadd.f32 %v1884_v49, %v1883_v46  ;;  %v1946_v53 = vadd.f32 %v1945_v52, %v1944_v48  ;;  %v1947_v54 = vpop.f32.mrb[26].mxu1 }
 0x173   :  { %v1948_v56 = vpop.f32.mrb[27].mxu1 }
 0x174   :  { %v976_v55 = vadd.f32 %v1885_v51, %v2579_v57  ;;  %v2644_v58 = vadd.f32 %v1946_v53, %v973_v50  ;;  %v1949_v59 = vadd.f32 %v1948_v56, %v1947_v54 }
 0x176   :  { %v1886_v60 = vpop.f32.mrb[28].mxu0  ;;  %v2646_v62 = vadd.f32 %v1949_v59, %v976_v55 }
 0x177   :  { %v1887_v63 = vpop.f32.mrb[29].mxu0 }
 0x178   :  { %v1888_v1 = vadd.f32 %v1887_v63, %v1886_v60  ;;  %v1889_v2 = vpop.f32.mrb[30].mxu0  ;;  %v1950_v3 = vpop.f32.mrb[28].mxu1 }
 0x179   :  { %v1890_v4 = vpop.f32.mrb[31].mxu0  ;;  %v1951_v10 = vpop.f32.mrb[29].mxu1 }
 0x17a   :  { %v981_v5 = vadd.f32 %v1888_v1, %v2579_v57  ;;  %v1891_v9 = vadd.f32 %v1890_v4, %v1889_v2  ;;  %v1952_v12 = vadd.f32 %v1951_v10, %v1950_v3  ;;  %v1953_v13 = vpop.f32.mrb[30].mxu1 }
 0x17b   :  { %v1954_v16 = vpop.f32.mrb[31].mxu1 }
 0x17c   :  { %v984_v14 = vadd.f32 %v1891_v9, %v2579_v57  ;;  %v2650_v17 = vadd.f32 %v1952_v12, %v981_v5  ;;  %v1955_v19 = vadd.f32 %v1954_v16, %v1953_v13 }
 0x17e   :  { %v1972_v20 = vpop.f32.mrb[32].mxu0  ;;  %v2652_v22 = vadd.f32 %v1955_v19, %v984_v14 }
 0x17f   :  { %v1973_v23 = vpop.f32.mrb[33].mxu0 }
 0x180   :  { %v1974_v24 = vadd.f32 %v1973_v23, %v1972_v20  ;;  %v1975_v27 = vpop.f32.mrb[34].mxu0  ;;  %v2086_v30 = vpop.f32.mrb[32].mxu1 }
 0x181   :  { %v1976_v28 = vpop.f32.mrb[35].mxu0  ;;  %v1215_v34 = vpop.f32.mrb[33].mxu1 }
 0x182   :  { %v1977_v31 = vadd.f32 %v1976_v28, %v1975_v27  ;;  %v1119_v32 = vadd.f32 %v1974_v24, %v2587_v8  ;;  %v2087_v35 = vpop.f32.mrb[34].mxu1 }
 0x183   :  { %v1218_v37 = vpop.f32.mrb[35].mxu1 }
 0x184   :  { %v1216_v36 = vadd.f32 %v1215_v34, %v1119_v32  ;;  %v1122_v57 = vadd.f32 %v1977_v31, %v2591_v11 }
 0x186   :  { %v1219_v39 = vadd.f32 %v1218_v37, %v1122_v57  ;;  %v1978_v40 = vpop.f32.mrb[36].mxu0  ;;  %v1278_v45 = vmax.f32 %v1216_v36, 0.0 }
 0x187   :  { %v1979_v42 = vpop.f32.mrb[37].mxu0 }
 0x188   :  { %v1279_v46 = vmax.f32 %v1219_v39, 0.0  ;;  %v1980_v48 = vadd.f32 %v1979_v42, %v1978_v40  ;;  %v1981_v49 = vpop.f32.mrb[38].mxu0  ;;  %v2090_v51 = vpop.f32.mrb[36].mxu1 }
 0x189   :  { %v1982_v50 = vpop.f32.mrb[39].mxu0  ;;  %v1231_v8 = vpop.f32.mrb[37].mxu1 }
 0x18a   :  { %v1294_v52 = vpack.c.bf16 %v1279_v46, %v1278_v45  ;;  %v1127_v53 = vadd.f32 %v1980_v48, %v2603_v26  ;;  %v1983_v54 = vadd.f32 %v1982_v50, %v1981_v49  ;;  %v2091_v55 = vpop.f32.mrb[38].mxu1 }
 0x18b   :  { %v1234_v11 = vpop.f32.mrb[39].mxu1 }
 0x18c   :  { %v1224_v56 = vadd.f32 %v2086_v30, %v1127_v53  ;;  %v1130_v59 = vadd.f32 %v1983_v54, %v2605_v29  ;;  %2116 = vmatprep.mubr.bf16.mxu1 %v1294_v52 }
 0x18e   :  { %v1227_v60 = vadd.f32 %v2087_v35, %v1130_v59  ;;  %v1984_v63 = vpop.f32.mrb[40].mxu0  ;;  %v1280_v2 = vmax.f32 %v1224_v56, 0.0 }
 0x18f   :  { %v1985_v1 = vpop.f32.mrb[41].mxu0 }
 0x190   :  { %v1281_v3 = vmax.f32 %v1227_v60, 0.0  ;;  %v1986_v4 = vadd.f32 %v1985_v1, %v1984_v63  ;;  %v1987_v5 = vpop.f32.mrb[42].mxu0  ;;  %v2658_v10 = vpop.f32.mrb[40].mxu1 }
 0x191   :  { %v1988_v9 = vpop.f32.mrb[43].mxu0  ;;  %v1247_v14 = vpop.f32.mrb[41].mxu1 }
 0x192   :  { %v1295_v12 = vpack.c.bf16 %v1281_v3, %v1280_v2  ;;  %v1989_v26 = vadd.f32 %v1988_v9, %v1987_v5  ;;  %v1135_v13 = vadd.f32 %v1986_v4, %v2617_v44  ;;  %v2095_v16 = vpop.f32.mrb[42].mxu1 }
 0x193   :  { %v1250_v20 = vpop.f32.mrb[43].mxu1 }
 0x194   :  { %v1232_v19 = vadd.f32 %v1231_v8, %v1135_v13  ;;  %2117 = vmatmul.mubr.bf16.vlgmr.msra.gmra.mrb[48].mxu1 %v1295_v12  ;;  %v1138_v29 = vadd.f32 %v1989_v26, %v2619_v47 }
 0x195   :  { %2172 = vmatpush3.bf16.msra.mxu1 %v2583_v6 }
 0x196   :  { %v1235_v23 = vadd.f32 %v1234_v11, %v1138_v29  ;;  %v1990_v24 = vpop.f32.mrb[44].mxu0  ;;  %2165 = vmatprep.subr.bf16.mxu1 %v2585_v7  ;;  %v1282_v28 = vmax.f32 %v1232_v19, 0.0 }
 0x197   :  { %v1991_v27 = vpop.f32.mrb[45].mxu0 }
 0x198   :  { %v1283_v30 = vmax.f32 %v1235_v23, 0.0  ;;  %v1992_v31 = vadd.f32 %v1991_v27, %v1990_v24  ;;  %v1993_v32 = vpop.f32.mrb[46].mxu0  ;;  %v2664_v44 = vpop.f32.mrb[44].mxu1 }
 0x199   :  { %v1994_v34 = vpop.f32.mrb[47].mxu0  ;;  %2173 = vmatpush3.bf16.msra.mxu1 %v2585_v7  ;;  %v1263_v57 = vpop.f32.mrb[45].mxu1 }
 0x19a   :  { %v1296_v35 = vpack.c.bf16 %v1283_v30, %v1282_v28  ;;  %v1143_v47 = vadd.f32 %v1992_v31, %v2626_v61  ;;  %v1995_v36 = vadd.f32 %v1994_v34, %v1993_v32  ;;  %2166 = vmatprep.subr.bf16.mxu1 %v2595_v15  ;;  %v2669_v6 = vpop.f32.mrb[46].mxu1 }
 0x19b   :  { %v1266_v40 = vpop.f32.mrb[47].mxu1 }
 0x19c   :  { %v1240_v37 = vadd.f32 %v2090_v51, %v1143_v47  ;;  %v1146_v39 = vadd.f32 %v1995_v36, %v2628_v0  ;;  %2120 = vmatprep.mubr.bf16.mxu1 %v1296_v35 }
 0x19d   :  { %2174 = vmatpush3.bf16.msra.mxu1 %v2595_v15 }
 0x19e   :  { %v1243_v42 = vadd.f32 %v2091_v55, %v1146_v39  ;;  %v1996_v45 = vpop.f32.mrb[48].mxu0  ;;  %2167 = vmatprep.subr.bf16.mxu1 %v2601_v25  ;;  %v1284_v46 = vmax.f32 %v1240_v37, 0.0  ;;  %v2342_v37 = vld [vmem:[#allocation8 + $0x38] sm:$0xff]  }
 0x19f   :  { %v1997_v7 = vpop.f32.mrb[49].mxu0 }
 0x1a0   :  { %v1285_v61 = vmax.f32 %v1243_v42, 0.0  ;;  %v1998_v48 = vadd.f32 %v1997_v7, %v1996_v45  ;;  %v1999_v49 = vpop.f32.mrb[50].mxu0 }
 0x1a1   :  { %v2000_v50 = vpop.f32.mrb[51].mxu0  ;;  %2175 = vmatpush3.bf16.msra.mxu1 %v2601_v25 }
 0x1a2   :  { %v2001_v52 = vadd.f32 %v2000_v50, %v1999_v49  ;;  %v1151_v51 = vadd.f32 %v1998_v48, %v2632_v18  ;;  %v1297_v0 = vpack.c.bf16 %v1285_v61, %v1284_v46  ;;  %2168 = vmatprep.subr.bf16.mxu1 %v2609_v33 }
 0x1a4   :  { %v1248_v53 = vadd.f32 %v1247_v14, %v1151_v51  ;;  %2121 = vmatmul.mubr.bf16.gmra.mrb[52].mxu1 %v1297_v0  ;;  %v1154_v15 = vadd.f32 %v2001_v52, %v2634_v21 }
 0x1a5   :  { %2176 = vmatpush3.bf16.msra.mxu1 %v2609_v33 }
 0x1a6   :  { %v1251_v54 = vadd.f32 %v1250_v20, %v1154_v15  ;;  %v2002_v8 = vpop.f32.mrb[52].mxu0  ;;  %2169 = vmatprep.subr.bf16.mxu1 %v2615_v43  ;;  %v1286_v56 = vmax.f32 %v1248_v53, 0.0 }
 0x1a7   :  { %v2003_v55 = vpop.f32.mrb[53].mxu0 }
 0x1a8   :  { %v1287_v59 = vmax.f32 %v1251_v54, 0.0  ;;  %v2004_v25 = vadd.f32 %v2003_v55, %v2002_v8  ;;  %v2005_v11 = vpop.f32.mrb[54].mxu0 }
 0x1a9   :  { %v2006_v60 = vpop.f32.mrb[55].mxu0  ;;  %2177 = vmatpush3.bf16.msra.mxu1 %v2615_v43 }
 0x1aa   :  { %v1298_v18 = vpack.c.bf16 %v1287_v59, %v1286_v56  ;;  %v1159_v63 = vadd.f32 %v2004_v25, %v2638_v38  ;;  %v2007_v1 = vadd.f32 %v2006_v60, %v2005_v11 }
 0x1ac   :  { %v1256_v21 = vadd.f32 %v2658_v10, %v1159_v63  ;;  %v1162_v33 = vadd.f32 %v2007_v1, %v2640_v41  ;;  %2124 = vmatprep.mubr.bf16.mxu1 %v1298_v18 }
 0x1ae   :  { %v1259_v2 = vadd.f32 %v2095_v16, %v1162_v33  ;;  %v2008_v3 = vpop.f32.mrb[56].mxu0  ;;  %v1288_v5 = vmax.f32 %v1256_v21, 0.0 }
 0x1af   :  { %v2009_v4 = vpop.f32.mrb[57].mxu0 }
 0x1b0   :  { %v1289_v9 = vmax.f32 %v1259_v2, 0.0  ;;  %v2010_v12 = vadd.f32 %v2009_v4, %v2008_v3  ;;  %v2011_v26 = vpop.f32.mrb[58].mxu0 }
 0x1b1   :  { %v2012_v13 = vpop.f32.mrb[59].mxu0 }
 0x1b2   :  { %v2013_v14 = vadd.f32 %v2012_v13, %v2011_v26  ;;  %v1167_v43 = vadd.f32 %v2010_v12, %v2644_v58  ;;  %v1299_v19 = vpack.c.bf16 %v1289_v9, %v1288_v5 }
 0x1b4   :  { %v1264_v29 = vadd.f32 %v1263_v57, %v1167_v43  ;;  %2125 = vmatmul.mubr.bf16.gmra.mrb[56].mxu1 %v1299_v19  ;;  %v1170_v38 = vadd.f32 %v2013_v14, %v2646_v62  ;;  %v2341_v57 = vld [vmem:[#allocation8 + $0x30] sm:$0xff]  }
 0x1b5   :  { %2144 = vmatprep.subr.bf16.mxu0 %v2341_v57  ;;  %2170 = vmatprep.subr.bf16.mxu1 %v2341_v57 }
 0x1b6   :  { %v1267_v10 = vadd.f32 %v1266_v40, %v1170_v38  ;;  %v2014_v20 = vpop.f32.mrb[60].mxu0  ;;  %v1290_v23 = vmax.f32 %v1264_v29, 0.0  ;;  %2145 = vmatpush3.bf16.msra.mxu0 %v2341_v57  ;;  %2178 = vmatpush3.bf16.msra.mxu1 %v2341_v57 }
 0x1b7   :  { %v2015_v41 = vpop.f32.mrb[61].mxu0  ;;  %2146 = vmatprep.subr.bf16.mxu0 %v2342_v37  ;;  %2171 = vmatprep.subr.bf16.mxu1 %v2342_v37 }
 0x1b8   :  { %v1291_v16 = vmax.f32 %v1267_v10, 0.0  ;;  %v2016_v24 = vadd.f32 %v2015_v41, %v2014_v20  ;;  %v2017_v27 = vpop.f32.mrb[62].mxu0 }
 0x1b9   :  { %v2018_v28 = vpop.f32.mrb[63].mxu0 }
 0x1ba   :  { %v1300_v30 = vpack.c.bf16 %v1291_v16, %v1290_v23  ;;  %v1175_v31 = vadd.f32 %v2016_v24, %v2650_v17  ;;  %v2019_v32 = vadd.f32 %v2018_v28, %v2017_v27  ;;  %2147 = vmatpush3.bf16.msra.mxu0 %v2342_v37  ;;  %2179 = vmatpush3.bf16.msra.mxu1 %v2342_v37  ;;  %v1810_v17 = vld [vmem:[%s2712_s4] ss:$0 sm:$0xff] }
 0x1bc   :  { %v1272_v34 = vadd.f32 %v2664_v44, %v1175_v31  ;;  %v1178_v58 = vadd.f32 %v2019_v32, %v2652_v22  ;;  %2128 = vmatprep.mubr.bf16.mxu1 %v1300_v30 }
 0x1be   :  { %v1275_v35 = vadd.f32 %v2669_v6, %v1178_v58  ;;  %v1292_v62 = vmax.f32 %v1272_v34, 0.0  ;;  %v1819_v58 = vld [vmem:[%s2714_s6] ss:$0 sm:$0xff]  ;;  %s2469_s6 = smov [#allocation10]  }
 0x1bf   :  { %s1683_s29 = sshll.u32 %s2469_s6, 4  ;;  %s1684_s29 = int_to_ptr.vmem [resolvable:$true] %s1683_s29 }
 0x1c0   :  { %v1293_v47 = vmax.f32 %v1275_v35, 0.0  ;;  %s2431_s30 = scalar_lea.vmem %s1684_s29, 2048  ;;  %p2436_p5 = scmp.lt.s32.totalorder %s1684_s29, %s1684_s29 }
 0x1c1   :  { %p2432_p4 = scmp.ne.s32.totalorder %s1684_s29, %s2431_s30  ;;  %p2437_p6 = scmp.lt.s32.totalorder %s2431_s30, %s2431_s30 }
 0x1c2   :  { %v1301_v36 = vpack.c.bf16 %v1293_v47, %v1292_v62 }
 0x1c3   :  { %p2438_p7 = por %p2437_p6, %p2436_p5 }
 0x1c4   :  { %2129 = vmatmul.mubr.bf16.gmra.mrb[60].mxu1 %v1301_v36 }
 0x1c5   :  { %p2439_p8 = pnand %p2438_p7, %p2432_p4 }
 0x267   :  { %v2118_v22 = vpop.f32.mrb[48].mxu1 }
 0x268   :  { %v1416_v44 = vadd.f32 %v2118_v22, %v1810_v17  ;;  %v1407_v6 = vpop.f32.mrb[49].mxu1 }
 0x269   :  { %v1408_v39 = vadd.f32 %v1810_v17, %v1407_v6  ;;  %v2119_v40 = vpop.f32.mrb[50].mxu1 }
 0x26a   :  { %v1419_v42 = vadd.f32 %v2119_v40, %v1810_v17  ;;  %v1410_v45 = vpop.f32.mrb[51].mxu1  ;;  %v1472_v46 = vmax.f32 %v1416_v44, 0.0 }
 0x26b   :  { %v1411_v7 = vadd.f32 %v1810_v17, %v1410_v45  ;;  %v1470_v48 = vmax.f32 %v1408_v39, 0.0 }
 0x26c   :  { %v1473_v61 = vmax.f32 %v1419_v42, 0.0 }
 0x26d   :  { %v1471_v49 = vmax.f32 %v1411_v7, 0.0 }
 0x26e   :  { %v1487_v50 = vpack.c.bf16 %v1473_v61, %v1472_v46 }
 0x26f   :  { %v1486_v52 = vpack.c.bf16 %v1471_v49, %v1470_v48 }
 0x271   :  { %2148 = vmatprep.mubr.bf16.mxu0 %v1486_v52 }
 0x272   :  { %2149 = vmatmul.mubr.bf16.vlgmr.msra.gmra.mrb[64].mxu0 %v1487_v50 }
 0x277   :  { %v2122_v51 = vpop.f32.mrb[52].mxu1 }
 0x278   :  { %v1432_v0 = vadd.f32 %v2122_v51, %v1810_v17  ;;  %v1423_v53 = vpop.f32.mrb[53].mxu1 }
 0x279   :  { %v1424_v15 = vadd.f32 %v1810_v17, %v1423_v53  ;;  %v2123_v54 = vpop.f32.mrb[54].mxu1 }
 0x27a   :  { %v1435_v8 = vadd.f32 %v2123_v54, %v1810_v17  ;;  %v1426_v55 = vpop.f32.mrb[55].mxu1  ;;  %v1476_v59 = vmax.f32 %v1432_v0, 0.0 }
 0x27b   :  { %v1427_v56 = vadd.f32 %v1810_v17, %v1426_v55  ;;  %v1474_v11 = vmax.f32 %v1424_v15, 0.0 }
 0x27c   :  { %v1477_v25 = vmax.f32 %v1435_v8, 0.0 }
 0x27d   :  { %v1475_v60 = vmax.f32 %v1427_v56, 0.0 }
 0x27e   :  { %v1489_v18 = vpack.c.bf16 %v1477_v25, %v1476_v59 }
 0x27f   :  { %v1488_v63 = vpack.c.bf16 %v1475_v60, %v1474_v11 }
 0x281   :  { %2152 = vmatprep.mubr.bf16.mxu0 %v1488_v63 }
 0x282   :  { %2153 = vmatmul.mubr.bf16.gmra.mrb[68].mxu0 %v1489_v18 }
 0x287   :  { %v2126_v1 = vpop.f32.mrb[56].mxu1 }
 0x288   :  { %v1448_v21 = vadd.f32 %v2126_v1, %v1810_v17  ;;  %v1439_v33 = vpop.f32.mrb[57].mxu1 }
 0x289   :  { %v1440_v2 = vadd.f32 %v1810_v17, %v1439_v33  ;;  %v2127_v3 = vpop.f32.mrb[58].mxu1 }
 0x28a   :  { %v1451_v4 = vadd.f32 %v2127_v3, %v1810_v17  ;;  %v1442_v5 = vpop.f32.mrb[59].mxu1  ;;  %v1480_v12 = vmax.f32 %v1448_v21, 0.0 }
 0x28b   :  { %v1443_v9 = vadd.f32 %v1810_v17, %v1442_v5  ;;  %v1478_v13 = vmax.f32 %v1440_v2, 0.0 }
 0x28c   :  { %v1481_v26 = vmax.f32 %v1451_v4, 0.0 }
 0x28d   :  { %v1479_v14 = vmax.f32 %v1443_v9, 0.0 }
 0x28e   :  { %v1491_v43 = vpack.c.bf16 %v1481_v26, %v1480_v12 }
 0x28f   :  { %v1490_v19 = vpack.c.bf16 %v1479_v14, %v1478_v13 }
 0x291   :  { %2156 = vmatprep.mubr.bf16.mxu1 %v1490_v19 }
 0x292   :  { %2157 = vmatmul.mubr.bf16.vlgmr.msra.gmra.mrb[64].mxu1 %v1491_v43 }
 0x297   :  { %v2130_v29 = vpop.f32.mrb[60].mxu1 }
 0x298   :  { %v1464_v38 = vadd.f32 %v2130_v29, %v1810_v17  ;;  %v1455_v10 = vpop.f32.mrb[61].mxu1 }
 0x299   :  { %v1456_v20 = vadd.f32 %v1810_v17, %v1455_v10  ;;  %v2131_v41 = vpop.f32.mrb[62].mxu1 }
 0x29a   :  { %v1467_v23 = vadd.f32 %v2131_v41, %v1810_v17  ;;  %v1458_v16 = vpop.f32.mrb[63].mxu1  ;;  %v1484_v27 = vmax.f32 %v1464_v38, 0.0 }
 0x29b   :  { %v1459_v24 = vadd.f32 %v1810_v17, %v1458_v16  ;;  %v1482_v30 = vmax.f32 %v1456_v20, 0.0 }
 0x29c   :  { %v1485_v28 = vmax.f32 %v1467_v23, 0.0 }
 0x29d   :  { %v1483_v31 = vmax.f32 %v1459_v24, 0.0 }
 0x29e   :  { %v1493_v32 = vpack.c.bf16 %v1485_v28, %v1484_v27 }
 0x29f   :  { %v1492_v34 = vpack.c.bf16 %v1483_v31, %v1482_v30 }
 0x2a1   :  { %2160 = vmatprep.mubr.bf16.mxu1 %v1492_v34 }
 0x2a2   :  { %2161 = vmatmul.mubr.bf16.gmra.mrb[68].mxu1 %v1493_v32 }
 0x345   :  { %v2150_v35 = vpop.f32.mrb[64].mxu0 }
 0x346   :  { %v1608_v62 = vadd.f32 %v2150_v35, %v1819_v58  ;;  %v1599_v47 = vpop.f32.mrb[65].mxu0 }
 0x347   :  { %v1600_v36 = vadd.f32 %v1819_v58, %v1599_v47  ;;  %v2151_v57 = vpop.f32.mrb[66].mxu0 }
 0x348   :  { %1664 = vst [vmem:[#allocation10 + $0x10] sm:$0xff] %v1608_v62  ;;  %v1611_v37 = vadd.f32 %v2151_v57, %v1819_v58  ;;  %v1602_v17 = vpop.f32.mrb[67].mxu0 }
 0x349   :  { %1662 = vst [vmem:[#allocation10] sm:$0xff] %v1600_v36  ;;  %v1603_v22 = vadd.f32 %v1819_v58, %v1602_v17 }
 0x34a   :  { %1665 = vst [vmem:[#allocation10 + $0x18] sm:$0xff] %v1611_v37 }
 0x34b   :  { %1663 = vst [vmem:[#allocation10 + $0x8] sm:$0xff] %v1603_v22 }
 0x355   :  { %v2154_v44 = vpop.f32.mrb[68].mxu0 }
 0x356   :  { %v1624_v6 = vadd.f32 %v2154_v44, %v1819_v58  ;;  %v1615_v39 = vpop.f32.mrb[69].mxu0 }
 0x357   :  { %v1616_v40 = vadd.f32 %v1819_v58, %v1615_v39  ;;  %v2155_v42 = vpop.f32.mrb[70].mxu0 }
 0x358   :  { %1668 = vst [vmem:[#allocation10 + $0x30] sm:$0xff] %v1624_v6  ;;  %v1627_v45 = vadd.f32 %v2155_v42, %v1819_v58  ;;  %v1618_v7 = vpop.f32.mrb[71].mxu0 }
 0x359   :  { %1666 = vst [vmem:[#allocation10 + $0x20] sm:$0xff] %v1616_v40  ;;  %v1619_v46 = vadd.f32 %v1819_v58, %v1618_v7 }
 0x35a   :  { %1669 = vst [vmem:[#allocation10 + $0x38] sm:$0xff] %v1627_v45 }
 0x35b   :  { %1667 = vst [vmem:[#allocation10 + $0x28] sm:$0xff] %v1619_v46 }
 0x365   :  { %v2158_v61 = vpop.f32.mrb[64].mxu1 }
 0x366   :  { %v1640_v48 = vadd.f32 %v2158_v61, %v1819_v58  ;;  %v1631_v49 = vpop.f32.mrb[65].mxu1 }
 0x367   :  { %v1632_v50 = vadd.f32 %v1819_v58, %v1631_v49  ;;  %v2159_v52 = vpop.f32.mrb[66].mxu1 }
 0x368   :  { %1672 = vst [vmem:[#allocation10 + $0x50] sm:$0xff] %v1640_v48  ;;  %v1643_v51 = vadd.f32 %v2159_v52, %v1819_v58  ;;  %v1634_v0 = vpop.f32.mrb[67].mxu1 }
 0x369   :  { %1670 = vst [vmem:[#allocation10 + $0x40] sm:$0xff] %v1632_v50  ;;  %v1635_v53 = vadd.f32 %v1819_v58, %v1634_v0 }
 0x36a   :  { %1673 = vst [vmem:[#allocation10 + $0x58] sm:$0xff] %v1643_v51 }
 0x36b   :  { %1671 = vst [vmem:[#allocation10 + $0x48] sm:$0xff] %v1635_v53 }
 0x375   :  { %v2162_v15 = vpop.f32.mrb[68].mxu1 }
 0x376   :  { %v1656_v54 = vadd.f32 %v2162_v15, %v1819_v58  ;;  %v1647_v8 = vpop.f32.mrb[69].mxu1 }
 0x377   :  { %v1648_v55 = vadd.f32 %v1819_v58, %v1647_v8  ;;  %v2163_v56 = vpop.f32.mrb[70].mxu1 }
 0x378   :  { %1676 = vst [vmem:[#allocation10 + $0x70] sm:$0xff] %v1656_v54  ;;  %v1659_v59 = vadd.f32 %v2163_v56, %v1819_v58  ;;  %v1650_v25 = vpop.f32.mrb[71].mxu1 }
 0x379   :  { %1674 = vst [vmem:[#allocation10 + $0x60] sm:$0xff] %v1648_v55  ;;  %v1651_v11 = vadd.f32 %v1819_v58, %v1650_v25 }
 0x37a   :  { %1677 = vst [vmem:[#allocation10 + $0x78] sm:$0xff] %v1659_v59 }
 0x37b   :  { %1675 = vst [vmem:[#allocation10 + $0x68] sm:$0xff] %v1651_v11 }
 0x37c   :  { %2442 = shalt.err (!%p2439_p8)
}
 0x37d   :  { %s2443_s10 = scalar_lea.hbm %s2715_s7, 2048 }
 0x37e   :  { %p2444_p9 = scmp.ne.s32.totalorder %s2715_s7, %s2443_s10  ;;  %p2447_p10 = scmp.lt.u32.totalorder %s2443_s10, %s2715_s7 }
 0x380   :  { %p2449_p11 = pnand %p2447_p10, %p2444_p9 }
 0x382   :  { %2452 = shalt.err (!%p2449_p11)
}
 0x383   :  { %s2470_s18 = smov 128   ;;  %s2471_s0 = smov 8  }
 0x384   :  { %1689 = dma.vmem_to_hbm [thread:$0]  %s1684_s29, 2048, %s2715_s7, [#allocation4], %s2470_s18, %s2470_s18, %s2471_s0  }
 0x385   :  { %2459 = dma.done.wait [#allocation4], 2048  }
 0x386   :  { %2460 = vsyncadd [#allocation4], 4294965248 }
 0x387   :  { %1693 = vsyncpa [#allocation3], 1 }
 0x388   :  { %1694 = vsyncpa [#allocation6], 1 }
 0x389   :  { %1695 = vsyncpa [#allocation9], 1 }
 0x38a   :  { %1696 = vsyncpa [#allocation4], 1 }

</bundles_post_ra>
